<compile_context>
chip_gen: v6e
topology: v6e:2x2x1
jax: 0.10.0
libtpu: 0.0.40
codegen_flags: <defaults>
</compile_context>

<pallas_src>
import functools
import numpy as np
import jax
import jax.numpy as jnp
from jax import lax
from jax.experimental import pallas as pl
from jax.experimental.pallas import tpu as pltpu


# ----------------------------- in-kernel math ------------------------------

# A&S 7.1.26 erf coefficients; the GELU 1/sqrt(2) is folded into the p constant.
_ERF_P = np.float32(0.3275911 / np.sqrt(2.0))
_ERF_A = (np.float32(0.254829592), np.float32(-0.284496736),
          np.float32(1.421413741), np.float32(-1.453152027),
          np.float32(1.061405429))


def _gelu(x):
    # PyTorch nn.GELU() (erf form): 0.5*x*(1+erf(x/sqrt(2))).
    # TODO(synk): erf is the A&S rational approximation + EUP approx reciprocal
    # (~1e-3 rel error on GELU) rather than a bit-exact erf.
    a1, a2, a3, a4, a5 = _ERF_A
    ax = jnp.abs(x)
    t = pl.reciprocal(1.0 + _ERF_P * ax, approx=True)
    poly = ((((a5 * t + a4) * t + a3) * t + a2) * t + a1) * t
    e = 1.0 - poly * jnp.exp(np.float32(-0.5) * ax * ax)
    erf = jnp.where(x >= 0.0, e, -e)
    return 0.5 * x * (1.0 + erf)


def _layernorm_channel(x, w, b, eps):
    # LayerNormChannel over the channel (sublane) axis of the [C, N] tile.
    # Single pass: the two XLU reductions (sum x, sum x^2) are independent.
    mean = jnp.mean(x, axis=0, keepdims=True)
    var = jnp.maximum(jnp.mean(x * x, axis=0, keepdims=True) - mean * mean, 0.0)
    return (x - mean) * lax.rsqrt(var + eps) * w + b


def _pool_sum27(x, masks, stride_h, stride_d, n_pad):
    # Sum over the 3x3x3 neighbourhood (zero padding at volume borders) of every
    # token, computed separably with lane rotations (XLU) + boundary masks (VPU).
    def sum3(v, shift, m_fwd, m_bwd):
        fwd = pltpu.roll(v, n_pad - shift, axis=1)   # out[i] = v[i + shift]
        bwd = pltpu.roll(v, shift, axis=1)           # out[i] = v[i - shift]
        return v + fwd * m_fwd + bwd * m_bwd
    y = sum3(x, 1,        masks[0:1, :], masks[1:2, :])   # W axis
    y = sum3(y, stride_h, masks[2:3, :], masks[3:4, :])   # H axis
    y = sum3(y, stride_d, masks[4:5, :], masks[5:6, :])   # D axis
    return y


# ------------------------------ Pallas kernels ------------------------------

def _embed_kernel(patches_ref, we_ref, ep_ref, o_ref):
    # Patch embedding: strided Conv3d (kernel == stride) == one MXU matmul,
    # then LayerNormChannel(eps=1e-5).
    y = jnp.dot(we_ref[...], patches_ref[...], preferred_element_type=jnp.float32)
    ep = ep_ref[...]                              # (C, 3) = [bias | gamma | beta]
    o_ref[...] = _layernorm_channel(y + ep[:, 0:1], ep[:, 1:2], ep[:, 2:3], 1e-5)


def _layers_kernel(x0_hbm, masks_ref, small_ref, fc1w_ref, fc1b_ref, fc2w_ref,
                   o_ref, dma_sem, *, stride_h, stride_d, n_pad, chunk):
    b = pl.program_id(0)

    # Layer 0: pull this batch's embedded activation HBM -> resident VMEM block.
    @pl.when(pl.program_id(1) == 0)
    def _init():
        cp = pltpu.make_async_copy(x0_hbm.at[b], o_ref, dma_sem)
        cp.start()
        cp.wait()

    x = o_ref[...]                                # (C, n_pad) f32, VMEM-carried
    sm = small_ref[...]                           # (C, 5) packed per-layer params
    ln1w, ln1b = sm[:, 0:1], sm[:, 1:2]
    ln2w, ln2b, fc2b = sm[:, 2:3], sm[:, 3:4], sm[:, 4:5]

    # ---- token mixer: AvgPool3d(3,1,1,count_include_pad=True) - x + residual
    xn = _layernorm_channel(x, ln1w, ln1b, 1e-6)
    pooled = _pool_sum27(xn, masks_ref[...], stride_h, stride_d, n_pad)
    x = pooled * np.float32(1.0 / 27.0) + (x - xn)
    o_ref[...] = x                                # residual base for the MLP

    # ---- MLP: 1x1x1 conv -> GELU -> 1x1x1 conv, token-chunked ---------------
    # TODO(synk): Dropout(p=0.1) is identity (inference/eval mode).
    fc1w = fc1w_ref[...]                          # (M, C)  bf16
    fc1b = fc1b_ref[...]                          # (M, 1)  f32
    fc2w = fc2w_ref[...]                          # (C, M)  bf16

    def mlp_chunk(c, carry):
        s = pl.multiple_of(c * chunk, chunk)
        xc = o_ref[:, pl.ds(s, chunk)]
        xcn = _layernorm_channel(xc, ln2w, ln2b, 1e-6)
        y = jnp.dot(fc1w, xcn.astype(jnp.bfloat16),
                    preferred_element_type=jnp.float32) + fc1b
        y = _gelu(y)
        z = jnp.dot(fc2w, y.astype(jnp.bfloat16),
                    preferred_element_type=jnp.float32) + fc2b
        o_ref[:, pl.ds(s, chunk)] = xc + z
        return carry

    n_chunks = n_pad // chunk
    lax.fori_loop(0, n_chunks, mlp_chunk, 0, unroll=n_chunks <= 4)


# ------------------------------- host wrapper --------------------------------

def _round_up(v, m):
    return (v + m - 1) // m * m


def _mlp_chunk_size(n_pad, target=512):
    c = min(n_pad, target)
    while n_pad % c:
        c -= 128
    return max(c, 128)


def _pool_masks(dims_patch, n_pad):
    # 0/1 "neighbour exists" masks per token for the separable 3^3 pooling.
    # Padded lanes (>= N) never contribute to real lanes.
    Dp, Hp, Wp = dims_patch
    N = Dp * Hp * Wp
    idx = np.arange(n_pad)
    r = idx % max(N, 1)
    valid = idx < N
    dp = r // (Hp * Wp)
    hp = (r % (Hp * Wp)) // Wp
    wp = r % Wp
    m = np.stack([
        valid & (wp < Wp - 1),   # receive from w+1
        valid & (wp > 0),        # receive from w-1
        valid & (hp < Hp - 1),   # receive from h+1
        valid & (hp > 0),        # receive from h-1
        valid & (dp < Dp - 1),   # receive from d+1
        valid & (dp > 0),        # receive from d-1
    ]).astype(np.float32)
    return jnp.asarray(m)


def _vmem_limit(C, K, M, n_pad, chunk):
    f32, bf16 = 4, 2
    act = C * n_pad * f32
    est = (
        2 * act                                                    # output block
        + 2 * 6 * n_pad * f32                                      # pool masks
        + 2 * (C * 5 * f32 + M * C * bf16 + M * f32 + C * M * bf16)  # layer params
        + 5 * act                                                  # token-mixer temps
        + 4 * M * chunk * f32 + 2 * C * chunk * f32                # MLP chunk temps
        + 2 * (K * n_pad * bf16 + C * K * bf16)                    # embed-call inputs
    )
    est = int(est * 1.3) + (2 << 20)
    return int(min(max(est, 32 << 20), 64 << 20))


def prepare_params(params):
    """One-time conversion of PyTorch-layout params to kernel layout
    (bf16 MXU operands, packed per-layer small params)."""
    C = params['embed_w'].shape[0]
    K = int(np.prod(params['embed_w'].shape[1:]))
    L = len(params['layers'])
    M = params['layers'][0]['fc1_w'].shape[0]
    stack = lambda name: jnp.stack([lp[name] for lp in params['layers']])
    small = jnp.stack([jnp.stack([lp['ln1_w'], lp['ln1_b'], lp['ln2_w'],
                                  lp['ln2_b'], lp['fc2_b']], axis=1)
                       for lp in params['layers']])                       # (L, C, 5)
    embed_packed = jnp.stack([params['embed_b'], params['embed_ln_w'],
                              params['embed_ln_b']], axis=1)              # (C, 3)
    return {
        'C': C, 'K': K, 'L': L, 'M': M,
        'embed_w': params['embed_w'].reshape(C, K).astype(jnp.bfloat16),  # (C, K)
        'embed_packed': embed_packed.astype(jnp.float32),
        'small': small.astype(jnp.float32),                               # (L, C, 5)
        'fc1_w': stack('fc1_w').astype(jnp.bfloat16),                     # (L, M, C)
        'fc1_b': stack('fc1_b').reshape(L, M, 1).astype(jnp.float32),
        'fc2_w': stack('fc2_w').astype(jnp.bfloat16),                     # (L, C, M)
    }


def poolformer_forward(x, prep, patch_size):
    """x: [B, Cin, D, H, W] (PyTorch NCDHW). Returns [B, hidden, Dp, Hp, Wp]."""
    B, Cin, D, H, W = x.shape
    pd, ph, pw = patch_size
    Dp, Hp, Wp = D // pd, H // ph, W // pw
    N = Dp * Hp * Wp
    n_pad = _round_up(N, 128)                     # lane-dense per-batch token axis
    C, K, L, M = prep['C'], prep['K'], prep['L'], prep['M']
    chunk = _mlp_chunk_size(n_pad)
    vmem_limit = _vmem_limit(C, K, M, n_pad, chunk)

    # ---- glue: strided patch extraction (Conv3d with kernel == stride) ----
    xp = x.reshape(B, Cin, Dp, pd, Hp, ph, Wp, pw)
    xp = jnp.transpose(xp, (0, 1, 3, 5, 7, 2, 4, 6))   # (B, Cin,pd,ph,pw, Dp,Hp,Wp)
    patches = xp.reshape(B, K, N)
    if n_pad != N:
        patches = jnp.pad(patches, ((0, 0), (0, 0), (0, n_pad - N)))
    patches = patches.astype(jnp.bfloat16)

    masks = _pool_masks((Dp, Hp, Wp), n_pad)

    # ---- kernel 1: patch embedding + LayerNormChannel(eps=1e-5) ----
    x0 = pl.pallas_call(
        _embed_kernel,
        out_shape=jax.ShapeDtypeStruct((B, C, n_pad), jnp.float32),
        grid=(B,),
        in_specs=[
            pl.BlockSpec((None, K, n_pad), lambda b: (b, 0, 0)),
            pl.BlockSpec((C, K), lambda b: (0, 0)),
            pl.BlockSpec((C, 3), lambda b: (0, 0)),
        ],
        out_specs=pl.BlockSpec((None, C, n_pad), lambda b: (b, 0, 0)),
        compiler_params=pltpu.CompilerParams(
            dimension_semantics=("parallel",), vmem_limit_bytes=vmem_limit),
    )(patches, prep['embed_w'], prep['embed_packed'])

    # ---- kernel 2: all L PoolFormer blocks, activation VMEM-resident ----
    kern = functools.partial(_layers_kernel, stride_h=Wp, stride_d=Hp * Wp,
                             n_pad=n_pad, chunk=chunk)
    out = pl.pallas_call(
        kern,
        out_shape=jax.ShapeDtypeStruct((B, C, n_pad), jnp.float32),
        grid=(B, L),
        in_specs=[
            pl.BlockSpec(memory_space=pl.ANY),                   # x0 (HBM, read at l==0)
            pl.BlockSpec((6, n_pad), lambda b, l: (0, 0)),       # pool boundary masks
            pl.BlockSpec((None, C, 5), lambda b, l: (l, 0, 0)),  # packed ln1/ln2/fc2_b
            pl.BlockSpec((None, M, C), lambda b, l: (l, 0, 0)),  # fc1 weight (bf16)
            pl.BlockSpec((None, M, 1), lambda b, l: (l, 0, 0)),  # fc1 bias
            pl.BlockSpec((None, C, M), lambda b, l: (l, 0, 0)),  # fc2 weight (bf16)
        ],
        out_specs=pl.BlockSpec((None, C, n_pad), lambda b, l: (b, 0, 0)),
        scratch_shapes=[pltpu.SemaphoreType.DMA],
        compiler_params=pltpu.CompilerParams(
            dimension_semantics=("parallel", "arbitrary"),
            vmem_limit_bytes=vmem_limit),
    )(x0, masks, prep['small'], prep['fc1_w'], prep['fc1_b'], prep['fc2_w'])

    # back to the PyTorch convention on the patch grid: [B, C, Dp, Hp, Wp]
    return out[:, :, :N].reshape(B, C, Dp, Hp, Wp)


def init_params(key, in_channels, hidden, patch_size, mlp_dim, num_layers):
    pd, ph, pw = patch_size
    ks = jax.random.split(key, 2 + 4 * num_layers)
    params = {
        'embed_w': 0.05 * jax.random.normal(ks[0], (hidden, in_channels, pd, ph, pw), jnp.float32),
        'embed_b': 0.05 * jax.random.normal(ks[1], (hidden,), jnp.float32),
        'embed_ln_w': jnp.ones((hidden,), jnp.float32),
        'embed_ln_b': jnp.zeros((hidden,), jnp.float32),
        'layers': [],
    }
    for l in range(num_layers):
        k1, k2, k3, k4 = ks[2 + 4 * l: 6 + 4 * l]
        params['layers'].append({
            'ln1_w': jnp.ones((hidden,), jnp.float32),
            'ln1_b': jnp.zeros((hidden,), jnp.float32),
            'ln2_w': jnp.ones((hidden,), jnp.float32),
            'ln2_b': jnp.zeros((hidden,), jnp.float32),
            'fc1_w': 0.05 * jax.random.normal(k1, (mlp_dim, hidden), jnp.float32),
            'fc1_b': 0.05 * jax.random.normal(k2, (mlp_dim,), jnp.float32),
            'fc2_w': 0.05 * jax.random.normal(k3, (hidden, mlp_dim), jnp.float32),
            'fc2_b': 0.05 * jax.random.normal(k4, (hidden,), jnp.float32),
        })
    return params


if __name__ == "__main__":
    key = jax.random.PRNGKey(0)
    in_channels, hidden, mlp_dim = 4, 32, 64
    patch = (2, 2, 2)
    num_layers = 2

    kx, kp = jax.random.split(key)
    # PyTorch NCDHW input: [B, Cin, D, H, W]
    x = jax.random.normal(kx, (2, in_channels, 8, 8, 8), dtype=jnp.float32)
    params = init_params(kp, in_channels, hidden, patch, mlp_dim, num_layers)
    prep = prepare_params(params)          # one-time weight layout / bf16 prep

    out = poolformer_forward(x, prep, patch)
    jax.block_until_ready(out)
    assert out.shape == (2, hidden, 4, 4, 4)
    print("KERNEL_OK")
</pallas_src>

<mosaic_0001>
module attributes {stable_mosaic.version = 11 : i64} {
  func.func @_embed_kernel(%arg0: i32, %arg1: memref<1x32x128xbf16, #tpu.memory_space<vmem>>, %arg2: memref<32x32xbf16, #tpu.memory_space<vmem>>, %arg3: memref<32x3xf32, #tpu.memory_space<vmem>>, %arg4: memref<1x32x128xf32, #tpu.memory_space<vmem>>) attributes {dimension_semantics = [#tpu.dimension_semantics<parallel>], iteration_bounds = array<i64: 2>, scalar_prefetch = 0 : i64, scratch_operands = 0 : i64, tpu.core_type = #tpu.core_type<tc>, window_params = [{transform_indices = @transform_0, window_bounds = array<i64: 1, 32, 128>}, {pipeline_mode = #tpu.pipeline_mode<synchronous>, transform_indices = @transform_1, window_bounds = array<i64: 32, 32>}, {pipeline_mode = #tpu.pipeline_mode<synchronous>, transform_indices = @transform_2, window_bounds = array<i64: 32, 3>}, {transform_indices = @transform_3, window_bounds = array<i64: 1, 32, 128>}]} {
    %c0 = arith.constant 0 : index
    %c0_0 = arith.constant 0 : index
    %0 = vector.load %arg2[%c0, %c0_0] : memref<32x32xbf16, #tpu.memory_space<vmem>>, vector<32x32xbf16>
    %c0_1 = arith.constant 0 : index
    %c0_2 = arith.constant 0 : index
    %c0_3 = arith.constant 0 : index
    %1 = vector.load %arg1[%c0_1, %c0_2, %c0_3] : memref<1x32x128xbf16, #tpu.memory_space<vmem>>, vector<1x32x128xbf16>
    %2 = vector.shape_cast %1 : vector<1x32x128xbf16> to vector<32x128xbf16>
    %cst = arith.constant dense<0.000000e+00> : vector<32x128xf32>
    %3 = tpu.matmul %0, %2, %cst {dimension_numbers = #tpu.dot_dimension_numbers<[1], [0], [0], [1], [0, 0, 1, 1], [], []>} : vector<32x32xbf16>, vector<32x128xbf16>, vector<32x128xf32> -> vector<32x128xf32>
    %c0_4 = arith.constant 0 : index
    %c0_5 = arith.constant 0 : index
    %4 = vector.load %arg3[%c0_4, %c0_5] : memref<32x3xf32, #tpu.memory_space<vmem>>, vector<32x3xf32>
    %5 = vector.extract_strided_slice %4 {offsets = [0, 0], sizes = [32, 1], strides = [1, 1]} : vector<32x3xf32> to vector<32x1xf32>
    %6 = vector.broadcast %5 : vector<32x1xf32> to vector<32x128xf32>
    %7 = arith.addf %3, %6 : vector<32x128xf32>
    %8 = vector.extract_strided_slice %4 {offsets = [0, 1], sizes = [32, 1], strides = [1, 1]} : vector<32x3xf32> to vector<32x1xf32>
    %9 = vector.extract_strided_slice %4 {offsets = [0, 2], sizes = [32, 1], strides = [1, 1]} : vector<32x3xf32> to vector<32x1xf32>
    %cst_6 = arith.constant dense<0.000000e+00> : vector<128xf32>
    %10 = vector.multi_reduction <add>, %7, %cst_6 [0] : vector<32x128xf32> to vector<128xf32>
    %11 = vector.shape_cast %10 : vector<128xf32> to vector<1x128xf32>
    %cst_7 = arith.constant 3.200000e+01 : f32
    %12 = vector.broadcast %cst_7 : f32 to vector<1x128xf32>
    %13 = arith.divf %11, %12 : vector<1x128xf32>
    %14 = arith.mulf %7, %7 : vector<32x128xf32>
    %cst_8 = arith.constant dense<0.000000e+00> : vector<128xf32>
    %15 = vector.multi_reduction <add>, %14, %cst_8 [0] : vector<32x128xf32> to vector<128xf32>
    %16 = vector.shape_cast %15 : vector<128xf32> to vector<1x128xf32>
    %cst_9 = arith.constant 3.200000e+01 : f32
    %17 = vector.broadcast %cst_9 : f32 to vector<1x128xf32>
    %18 = arith.divf %16, %17 : vector<1x128xf32>
    %19 = arith.mulf %13, %13 : vector<1x128xf32>
    %20 = arith.subf %18, %19 : vector<1x128xf32>
    %cst_10 = arith.constant 0.000000e+00 : f32
    %21 = vector.broadcast %cst_10 : f32 to vector<1x128xf32>
    %22 = arith.maximumf %20, %21 : vector<1x128xf32>
    %23 = vector.broadcast %13 : vector<1x128xf32> to vector<32x128xf32>
    %24 = arith.subf %7, %23 : vector<32x128xf32>
    %cst_11 = arith.constant 9.99999974E-6 : f32
    %25 = vector.broadcast %cst_11 : f32 to vector<1x128xf32>
    %26 = arith.addf %22, %25 : vector<1x128xf32>
    %27 = math.rsqrt %26 : vector<1x128xf32>
    %28 = vector.broadcast %27 : vector<1x128xf32> to vector<32x128xf32>
    %29 = arith.mulf %24, %28 : vector<32x128xf32>
    %30 = vector.broadcast %8 : vector<32x1xf32> to vector<32x128xf32>
    %31 = arith.mulf %29, %30 : vector<32x128xf32>
    %32 = vector.broadcast %9 : vector<32x1xf32> to vector<32x128xf32>
    %33 = arith.addf %31, %32 : vector<32x128xf32>
    %c0_12 = arith.constant 0 : index
    %c0_13 = arith.constant 0 : index
    %c0_14 = arith.constant 0 : index
    %34 = vector.load %arg4[%c0_12, %c0_13, %c0_14] : memref<1x32x128xf32, #tpu.memory_space<vmem>>, vector<1x32x128xf32>
    %35 = vector.shape_cast %34 : vector<1x32x128xf32> to vector<32x128xf32>
    %36 = vector.shape_cast %33 : vector<32x128xf32> to vector<1x32x128xf32>
    tpu.vector_store %arg4[%c0_12, %c0_13, %c0_14], %36 {strides = array<i32>} : memref<1x32x128xf32, #tpu.memory_space<vmem>>, vector<1x32x128xf32>,
    return
  }
  func.func @transform_0(%arg0: i32) -> (i32, i32, i32) {
    %c0_i32 = arith.constant 0 : i32
    %c0_i32_0 = arith.constant 0 : i32
    %c0_i32_1 = arith.constant 0 : i32
    return %arg0, %c0_i32, %c0_i32_0 : i32, i32, i32
  }
  func.func @transform_1(%arg0: i32) -> (i32, i32) {
    %c0_i32 = arith.constant 0 : i32
    %c0_i32_0 = arith.constant 0 : i32
    %c0_i32_1 = arith.constant 0 : i32
    return %c0_i32, %c0_i32_0 : i32, i32
  }
  func.func @transform_2(%arg0: i32) -> (i32, i32) {
    %c0_i32 = arith.constant 0 : i32
    %c0_i32_0 = arith.constant 0 : i32
    %c0_i32_1 = arith.constant 0 : i32
    return %c0_i32, %c0_i32_0 : i32, i32
  }
  func.func @transform_3(%arg0: i32) -> (i32, i32, i32) {
    %c0_i32 = arith.constant 0 : i32
    %c0_i32_0 = arith.constant 0 : i32
    %c0_i32_1 = arith.constant 0 : i32
    return %arg0, %c0_i32, %c0_i32_0 : i32, i32, i32
  }
}

</mosaic_0001>

<bundles_post_ra>
// kernel: tpu_custom_call.1
= control target key start
LH: loop header
LB: loop body
LE: loop exit
PB: predicated region body
PF: predicated region fallthrough
CT: control target
= control target key end

     0   :  { %8 = vsyncpa [#allocation3], 0  ;;  %s827_s0 = inlined_call_operand.vmem [shape: bf16[2,32,128], index: 0, kind: input, shape index: {}]   ;;  %s828_s1 = inlined_call_operand.hbm [shape: bf16[32,32], index: 1, kind: input, shape index: {}]   ;;  %s829_s2 = inlined_call_operand.vmem [shape: f32[32,3], index: 2, kind: input, shape index: {}]   ;;  %s830_s3 = inlined_call_operand.hbm [shape: f32[2,32,128], index: 3, kind: output, shape index: {}]  }
   0x1   :  { %9 = vsyncpa [#allocation4], 0 }
   0x2   :  { %11 = vsyncpa [#allocation4 + $0x1], 0  ;;  %s689_s12 = smov 0   ;;  %s691_s13 = smov 0  }
   0x3   :  { %s693_s14 = smov 0   ;;  %s695_s15 = smov 0  }
   0x4 LB: > { %s710_s16 = sadd.s32 4294967295, %s658_s15   ;;  %s465_s17 = sadd.s32 4294967294, %s658_s15   ;;  %s658_s15 = sphi %s695_s15, %s838_s15   ;;  %s654_s14 = sphi %s693_s14, %s837_s14   ;;  %s650_s13 = sphi %s691_s13, %s836_s13   ;;  %s646_s12 = sphi %s689_s12, %s835_s12  }
   0x5   : > { %s714_s18 = sadd.s32 1, %s658_s15   ;;  %s92_s19 = sadd.s32 1, %s654_s14 }
   0x6   : > { %s89_s20 = ssub.s32 %s658_s15, %s714_s18  ;;  %p102_p0 = scmp.ne.s32.totalorder %s654_s14, %s650_s13 }
   0x7   : > { %p90_p1 = scmp.eq.s32.totalorder %s89_s20, 0  ;;  %p103_p2 = scmp.eq.s32.totalorder %s710_s16, 1 }
   0x8   : > { %p108_p3 = scmp.ne.s32.totalorder %s650_s13, %s646_s12  ;;  %p109_p4 = scmp.eq.s32.totalorder %s465_s17, 1 }
   0x9   : > { %s725_s21 = scalar_select %p90_p1, %s654_s14, %s92_s19  }
   0xa   : > { %p727_p5 = por %p103_p2, %p102_p0  ;;  %p731_p6 = por %p109_p4, %p108_p3 }
   0xb   : > { %p466_p7 = scmp.ge.s32.totalorder %s658_s15, 1  ;;  %p116_p8 = scmp.lt.s32.totalorder %s658_s15, 3 }
   0xc   : > { %s832_s23 = scalar_select %p731_p6, 1, 0 }
   0xd   : > { %p513_p9 = scmp.eq.s32.totalorder %s710_s16, 0  ;;  %p738_p10 = pnand %p466_p7, %p116_p8 }
   0xe   : > { %s660_s25 = smov [#allocation2]  }
   0xf   : > { %s128_s26 = sshll.u32 %s660_s25, 4  ;;  %p505_p11 = pneg %p738_p10  ;;  %s129_s26 = int_to_ptr.vmem [resolvable:$true] %s128_s26 }
  0x10   : > { %s579_s27 = scalar_lea.vmem %s129_s26, 256  ;;  %p587_p3 = scmp.lt.s32.totalorder %s129_s26, %s129_s26 }
  0x11   : > { %p506_p12 = pnand %p513_p9, %p505_p11  ;;  %p580_p0 = scmp.ne.s32.totalorder %s129_s26, %s579_s27 }
  0x12   : > { %p588_p4 = scmp.lt.s32.totalorder %s579_s27, %s579_s27 }
  0x13   : > { %p570_p13 = pneg %p506_p12 }
  0x14   : > { %p589_p6 = por %p588_p4, %p587_p3 }
  0x15   : > { %p582_p1 = pnand %p580_p0, %p570_p13 }
  0x17   : > { %p583_p2 = pneg %p582_p1 }
  0x19   : > { %p590_p7 = pnand %p589_p6, %p583_p2 }
  0x1b   : > { %593 = shalt.err (!%p590_p7)
}
  0x1c   : > { %s661_s28 = smov 64   ;;  %s662_s29 = smov 4  }
  0x1d   : > { %508 = dma.hbm_to_vmem [thread:$0]  (!%p506_p12), %s828_s1, 256, %s129_s26, [#allocation3], %s661_s28, %s661_s28, %s662_s29  }
  0x1e   : > { %155 = sbr.rel (%p738_p10) target bundleno = 315 (0x13b), region = 32 }
  0x23   : > { %637 = dma.done.wait (%p513_p9), [#allocation3], 256  }
  0x24   : > { %639 = vsyncadd (%p513_p9), [#allocation3], 4294967040  ;;  %p179_p8 = scmp.lt.s32.totalorder %s710_s16, 1  ;;  %v663_v0 = vmov 0   ;;  %vm239_vm0 = vcmask 261120   ;;  %v564_v3 = vld [vmem:[#allocation2] sm:$0xff]  }
  0x25   : > { %556 = vset.pattern.permute.xlu0 %v663_v0  ;;  %557 = vset.pattern.permute.xlu1 %v663_v0  ;;  %v193_v4 = vld [vmem:[%s829_s2] sm:$0xff]  ;;  %v195_v5 = vld [vmem:[%s829_s2 + $0x10] sm:$0xff]  ;;  %v565_v6 = vld [vmem:[#allocation2 + $0x8] sm:$0xff]   ;;  %v664_v9 = vmov 1   ;;  %v665_v10 = vmov 2   ;;  %s176_s27 = sand.u32 1, %s650_s13  }
  0x26   : > { %s180_s5 = scalar_select %p179_p8, %s710_s16, 1  ;;  %495 = vmatprep.mubr.msk.bf16.mxu0 %vm239_vm0, %v564_v3  ;;  %199 = vperm.xlu0 %556, %v193_v4   ;;  %v194_v7 = vld [vmem:[%s829_s2 + $0x8] sm:$0xff]  ;;  %v196_v8 = vld [vmem:[%s829_s2 + $0x18] sm:$0xff] }
  0x27   : > { %209 = vperm.xlu1 %557, %v195_v5   ;;  %s471_s28 = sshll.u32 %s176_s27, 5  ;;  %s486_s4 = sshll.u32 %s710_s16, 9 }
  0x28   : > { %s485_s6 = sshll.u32 %s180_s5, 4  ;;  %s178_s29 = scalar_lea.vmem [#allocation5], %s471_s28 }
  0x29   : > { %s183_s9 = scalar_lea.vmem %s827_s0, %s485_s6  ;;  %s391_s30 = sshll.u32 %s178_s29, 4  ;;  %s778_s30 = int_to_ptr.vmem [resolvable:$true] %s391_s30 }
  0x2a   : > { %v562_v1 = vld [vmem:[%s183_s9 + $0x8] sm:$0xff]   ;;  %v563_v2 = vld [vmem:[%s183_s9] sm:$0xff]   ;;  %204 = vperm.xlu0 %556, %v194_v7   ;;  %s783_s7 = scalar_lea.hbm %s830_s3, %s486_s4  ;;  %s787_s16 = scalar_lea.sflag [#allocation4], %s176_s27 }
  0x2b   : > { %491 = vmatprep.subr.bf16.mxu0 %v562_v1  ;;  %214 = vperm.xlu1 %557, %v196_v8   ;;  %s594_s8 = scalar_lea.vmem %s778_s30, 512  ;;  %s666_s9 = smov [#allocation5]  }
  0x2c   : > { %492 = vmatpush3.bf16.msra.mxu0 %v562_v1  ;;  %p595_p6 = scmp.ne.s32.totalorder %s778_s30, %s594_s8  ;;  %s598_s10 = sshll.u32 %s666_s9, 4  ;;  %s599_s10 = int_to_ptr.vmem [resolvable:$false] %s598_s10 }
  0x2d   : > { %493 = vmatprep.subr.bf16.mxu0 %v563_v2  ;;  %s600_s11 = scalar_lea.vmem %s599_s10, 1024  ;;  %p601_p11 = scmp.lt.s32.totalorder %s778_s30, %s599_s10 }
  0x2e   : > { %558 = vset.pattern.permute.xlu0 %v664_v9  ;;  %p596_p9 = pnand %p595_p6, %p727_p5  ;;  %p602_p12 = scmp.lt.s32.totalorder %s600_s11, %s594_s8 }
  0x2f   : > { %559 = vset.pattern.permute.xlu1 %v664_v9  ;;  %334 = vperm.xlu0 %558, %v193_v4  }
  0x30   : > { %494 = vmatpush3.bf16.msra.mxu0 %v563_v2  ;;  %338 = vperm.xlu1 %559, %v194_v7   ;;  %p597_p10 = pneg %p596_p9  ;;  %p603_p13 = por %p602_p12, %p601_p11 }
  0x32   : > { %p604_p0 = pnand %p603_p13, %p597_p10 }
  0x33   : > { %496 = vmatmul.mubr.msk.bf16.vlgmr.msra.gmra.mxu0 %vm239_vm0, %v565_v6  ;;  %346 = vperm.xlu0 %558, %v196_v8  }
  0x34   : > { %342 = vperm.xlu1 %559, %v195_v5  }
  0x37   : > { %561 = vset.pattern.permute.xlu0 %v665_v10 }
  0x38   : > { %560 = vset.pattern.permute.xlu1 %v665_v10  ;;  %358 = vperm.xlu0 %561, %v194_v7  }
  0x39   : > { %354 = vperm.xlu1 %560, %v193_v4  }
  0x3d   : > { %362 = vperm.xlu1 %560, %v195_v5  }
  0x41   : > { %366 = vperm.xlu1 %560, %v196_v8  }
  0xa1   : > { %v200_v11 = vpop.permute.xlu0 %199 }
  0xa2   : > { %v210_v12 = vpop.permute.xlu1 %209 }
  0xa5   : > { %v205_v16 = vpop.permute.xlu0 %204 }
  0xa6   : > { %v215_v18 = vpop.permute.xlu1 %214 }
  0xaa   : > { %v335_v54 = vpop.permute.xlu0 %334 }
  0xab   : > { %v339_v48 = vpop.permute.xlu1 %338 }
  0xae   : > { %v347_v56 = vpop.permute.xlu0 %346 }
  0xaf   : > { %v343_v52 = vpop.permute.xlu1 %342 }
  0xb3   : > { %v359_v2 = vpop.permute.xlu0 %358 }
  0xb4   : > { %v355_v53 = vpop.permute.xlu1 %354 }
  0xb8   : > { %v363_v55 = vpop.permute.xlu1 %362 }
  0xbc   : > { %v367_v7 = vpop.permute.xlu1 %366 }
  0xf3   : > { %v497_v13 = vpop.f32.mrf.mxu0 }
  0xf4   : > { %v289_v20 = vadd.f32 %v497_v13, %v210_v12 }
  0xf5   : > { %v280_v14 = vpop.f32.mrf.mxu0 }
  0xf6   : > { %v281_v17 = vadd.f32 %v280_v14, %v200_v11  ;;  %v308_v26 = vmul.f32 %v289_v20, %v289_v20 }
  0xf7   : > { %v498_v15 = vpop.f32.mrf.mxu0 }
  0xf8   : > { %v306_v22 = vmul.f32 %v281_v17, %v281_v17  ;;  %v292_v23 = vadd.f32 %v498_v15, %v215_v18 }
  0xf9   : > { %v283_v19 = vpop.f32.mrf.mxu0 }
  0xfa   : > { %v284_v21 = vadd.f32 %v283_v19, %v205_v16  ;;  %v309_v29 = vmul.f32 %v292_v23, %v292_v23 }
  0xfc   : > { %v295_v24 = vadd.f32 %v284_v21, %v281_v17  ;;  %v307_v25 = vmul.f32 %v284_v21, %v284_v21 }
  0xfe   : > { %v296_v27 = vadd.f32 %v295_v24, %v289_v20  ;;  %v310_v28 = vadd.f32 %v307_v25, %v306_v22 }
 0x100   : > { %v297_v30 = vadd.f32 %v296_v27, %v292_v23  ;;  %v311_v31 = vadd.f32 %v310_v28, %v308_v26 }
 0x102   : > { %v298_v32 = vrot.slane %v297_v30, 4  ;;  %v312_v33 = vadd.f32 %v311_v31, %v309_v29 }
 0x104   : > { %v299_v34 = vadd.f32 %v298_v32, %v297_v30  ;;  %v313_v35 = vrot.slane %v312_v33, 4 }
 0x106   : > { %v300_v36 = vrot.slane %v299_v34, 2  ;;  %v314_v37 = vadd.f32 %v313_v35, %v312_v33 }
 0x108   : > { %v301_v38 = vadd.f32 %v300_v36, %v299_v34  ;;  %v315_v39 = vrot.slane %v314_v37, 2 }
 0x10a   : > { %v302_v40 = vrot.slane %v301_v38, 1  ;;  %v316_v41 = vadd.f32 %v315_v39, %v314_v37 }
 0x10c   : > { %v303_v42 = vadd.f32 %v302_v40, %v301_v38  ;;  %v317_v43 = vrot.slane %v316_v41, 1 }
 0x10e   : > { %v305_v44 = vmul.f32 0.03125, %v303_v42  ;;  %v318_v45 = vadd.f32 %v317_v43, %v316_v41 }
 0x110   : > { %v319_v46 = vmul.f32 0.03125, %v318_v45  ;;  %v320_v47 = vmul.f32 %v305_v44, %v305_v44  ;;  %v324_v57 = vsub.f32 %v284_v21, %v305_v44  ;;  %v325_v58 = vsub.f32 %v289_v20, %v305_v44 }
 0x111   : > { %v323_v59 = vsub.f32 %v281_v17, %v305_v44  ;;  %v326_v60 = vsub.f32 %v292_v23, %v305_v44 }
 0x112   : > { %v321_v49 = vsub.f32 %v319_v46, %v320_v47 }
 0x114   : > { %v322_v50 = vmax.f32 %v321_v49, 0.0 }
 0x116   : > { %v327_v51 = vadd.f32 1e-05, %v322_v50 }
 0x118   : > { %566 = vrsqrt.f32 %v327_v51 }
 0x125   : > { %v567_v61 = vpop.eup %566 }
 0x126   : > { %v330_v62 = vmul.f32 %v567_v61, %v324_v57  ;;  %v331_v63 = vmul.f32 %v567_v61, %v325_v58  ;;  %v329_v0 = vmul.f32 %v567_v61, %v323_v59  ;;  %v332_v1 = vmul.f32 %v567_v61, %v326_v60 }
 0x128   : > { %v350_v3 = vmul.f32 %v339_v48, %v330_v62  ;;  %v351_v4 = vmul.f32 %v343_v52, %v331_v63  ;;  %v349_v5 = vmul.f32 %v335_v54, %v329_v0  ;;  %v352_v6 = vmul.f32 %v347_v56, %v332_v1 }
 0x12a   : > { %v369_v8 = vadd.f32 %v355_v53, %v349_v5  ;;  %v371_v9 = vadd.f32 %v363_v55, %v351_v4  ;;  %v372_v10 = vadd.f32 %v367_v7, %v352_v6  ;;  %v370_v11 = vadd.f32 %v359_v2, %v350_v3 }
 0x12c   : > { %373 = vst [vmem:[%s178_s29] sm:$0xff] %v369_v8  ;;  %375 = vst [vmem:[%s178_s29 + $0x10] sm:$0xff] %v371_v9 }
 0x12d   : > { %376 = vst [vmem:[%s178_s29 + $0x18] sm:$0xff] %v372_v10  ;;  %374 = vst [vmem:[%s178_s29 + $0x8] sm:$0xff] %v370_v11 }
 0x12e   : > { %607 = shalt.err (!%p604_p0)
}
 0x12f   : > { %s608_s17 = scalar_lea.hbm %s783_s7, 512  ;;  %s612_s24 = scalar_lea.hbm %s830_s3, 1024 }
 0x130   : > { %p609_p1 = scmp.ne.s32.totalorder %s783_s7, %s608_s17  ;;  %p613_p4 = scmp.lt.s32.totalorder %s783_s7, %s830_s3 }
 0x131   : > { %p614_p7 = scmp.lt.s32.totalorder %s612_s24, %s608_s17 }
 0x132   : > { %p610_p2 = pnand %p609_p1, %p727_p5 }
 0x133   : > { %p615_p8 = por %p614_p7, %p613_p4 }
 0x134   : > { %p611_p3 = pneg %p610_p2 }
 0x136   : > { %p616_p6 = pnand %p615_p8, %p611_p3 }
 0x138   : > { %619 = shalt.err (!%p616_p6)
}
 0x139   : > { %s667_s27 = smov 128   ;;  %s668_s28 = smov 8  }
 0x13a   : > { %503 = dma.vmem_to_hbm [thread:$0]  (%p727_p5), %s778_s30, 512, %s783_s7, %s787_s16, %s667_s27, %s667_s27, %s668_s28  }
 0x13b PF: > { %p515_p9 = scmp.ge.s32.totalorder %s658_s15, 2  ;;  %s406_s29 = sand.u32 1, %s646_s12  }
 0x13c   : > { %p834_p10 = scmp.ne.s32.totalorder %s832_s23, 0  ;;  %s407_s4 = scalar_lea.sflag [#allocation4], %s406_s29 }
 0x13e   : > { %p510_p11 = pnand %p515_p9, %p834_p10 }
 0x140   : > { %p511_p12 = pneg %p510_p11 }
 0x142   : > { %641 = dma.done.wait (%p511_p12), %s407_s4, 512  }
 0x143   : > { %643 = vsyncadd (%p511_p12), %s407_s4, 4294966784  ;;  %p14_p13 = scmp.ge.s32.totalorder %s714_s18, 4   ;;  %s835_s12 = smov %s650_s13 }
 0x144   : > { %s836_s13 = smov %s654_s14  ;;  %s837_s14 = smov %s725_s21 }
 0x145   : > { %s838_s15 = smov %s714_s18  ;;  %16 = sbr.rel (!%p14_p13) target bundleno = 4 (0x4), region = 72 }
 0x14a   :  { %412 = vsyncpa [#allocation3], 1 }
 0x14b   :  { %414 = vsyncpa [#allocation3 + $0x1], 1 }
 0x14c   :  { %415 = vsyncpa [#allocation4], 1 }
 0x14d   :  { %417 = vsyncpa [#allocation4 + $0x1], 1 }

</bundles_post_ra>
